<compile_context>
chip_gen: v5e
topology: v5e:2x2
jax: 0.10.0
libtpu: 0.0.40
codegen_flags: <defaults>
</compile_context>

<pallas_src>
import jax
import jax.numpy as jnp
from jax import lax
from jax.experimental import pallas as pl
from jax.experimental.pallas import tpu as pltpu

# Deterministic "parameters" (same constants as the module's __init__).
# Both kernels are separable:
#   K3X = [1,2,1]^T x [-1,0,1]            K3Y = K3X^T
#   K5X = [1,4,6,4,1]^T x [1,2,0,-2,-1]   K5Y = K5X^T
K3X = ((-1.0, 0.0, 1.0),
       (-2.0, 0.0, 2.0),
       (-1.0, 0.0, 1.0))
K5X = ((1.0, 2.0, 0.0, -2.0, -1.0),
       (4.0, 8.0, 0.0, -8.0, -4.0),
       (6.0, 12.0, 0.0, -12.0, -6.0),
       (4.0, 8.0, 0.0, -8.0, -4.0),
       (1.0, 2.0, 0.0, -2.0, -1.0))


def _round_up(x, m):
    return ((x + m - 1) // m) * m


def _vmem_capacity_bytes():
    try:
        return int(pltpu.get_tpu_info().vmem_capacity_bytes)
    except Exception:
        return 64 * 1024 * 1024  # conservative: v7x per-TensorCore VMEM


def _make_sobel_kernel(H, W):
    """Kernel over one (TB, H, W) block of pred/target (one batch block).

    The diff image is placed at rows [2, 2+H), cols [2, 2+W) of a zero'd
    (TB, Hf, Wf) VMEM frame; the >=2-pixel zero margin on every side reproduces
    F.conv2d's zero padding for both the 3x3 (pad 1) and 5x5 (pad 2) taps, and
    makes pltpu.roll wraparound harmless (it only brings in zeros, or lands on
    rows/cols that the final validity mask removes).
    """

    def kernel(p_ref, t_ref, o_ref, frame):
        # --- fused diff into the zero halo frame -------------------------------
        frame[...] = jnp.zeros_like(frame)
        frame[:, 2:2 + H, 2:2 + W] = (p_ref[...].astype(jnp.float32)
                                      - t_ref[...].astype(jnp.float32))
        x = frame[...]                                     # (TB, Hf, Wf), aligned
        Hf, Wf = x.shape[1], x.shape[2]

        def rshift(a, k):  # row (sublane) shift: result[i] == a[i - k]
            return pltpu.roll(a, k % Hf, axis=1)

        def cshift(a, k):  # column (lane) shift: result[j] == a[j - k]
            return pltpu.roll(a, k % Wf, axis=2)

        rm1, rp1 = rshift(x, 1), rshift(x, -1)             # x[i-1], x[i+1]
        rm2, rp2 = rshift(x, 2), rshift(x, -2)             # x[i-2], x[i+2]

        # --- CSE'd vertical (separable) passes ----------------------------------
        s13 = rm1 + rp1
        s04 = rm2 + rp2
        vd3 = rp1 - rm1                                    # vertical [-1, 0, 1]
        d04 = rm2 - rp2
        vs3 = s13 + 2.0 * x                                # vertical [1, 2, 1]
        vs5 = s04 + 4.0 * s13 + 6.0 * x                    # vertical [1, 4, 6, 4, 1]
        vd5 = d04 - 2.0 * vd3                              # vertical [1, 2, 0, -2, -1]

        # --- horizontal passes + |.| accumulate ---------------------------------
        # |g3x|: horizontal [-1, 0, 1] of vs3
        acc = jnp.abs(cshift(vs3, -1) - cshift(vs3, 1))
        # |g3y|: horizontal [1, 2, 1] of vd3
        acc = acc + jnp.abs(cshift(vd3, 1) + 2.0 * vd3 + cshift(vd3, -1))
        # |g5x|: horizontal [1, 2, 0, -2, -1] of vs5
        acc = acc + jnp.abs((cshift(vs5, 2) - cshift(vs5, -2))
                            + 2.0 * (cshift(vs5, 1) - cshift(vs5, -1)))
        # |g5y|: horizontal [1, 4, 6, 4, 1] of vd5
        acc = acc + jnp.abs((cshift(vd5, 2) + cshift(vd5, -2))
                            + 4.0 * (cshift(vd5, 1) + cshift(vd5, -1))
                            + 6.0 * vd5)

        # Only the H x W window that corresponds to conv2d's output is valid;
        # halo rows/cols carry partial sums and are masked out.
        row = lax.broadcasted_iota(jnp.int32, x.shape, 1)
        col = lax.broadcasted_iota(jnp.int32, x.shape, 2)
        valid = (row >= 2) & (row < 2 + H) & (col >= 2) & (col < 2 + W)
        acc = jnp.where(valid, acc, 0.0)

        # Per-batch-block partial sum (keeps f32 drift small for large inputs).
        o_ref[...] = jnp.sum(acc).reshape(1, 1, 1)

    return kernel


def sobel_loss_pallas(pred, target, loss_weight=1.0, reduction='mean'):
    """pred, target: (N, C, H, W) with C == 1 (required by the reference conv2d)."""
    N, C, H, W = pred.shape
    assert C == 1, "SobelLoss conv kernels have a single input channel (C must be 1)"
    if reduction not in ('mean', 'sum'):
        raise NotImplementedError(
            "reduction='none' / elementwise weight not supported in the Pallas path")

    # Squeeze the channel dim (free metadata reshape, no HBM copy).
    p = pred.reshape(N, H, W)
    t = target.reshape(N, H, W)

    # Halo frame: 2-pixel zero margin on every side + (8, 128) alignment.
    Hf = _round_up(H + 4, 8)
    Wf = _round_up(W + 4, 128)

    # Generation-aware VMEM policy (128 MiB on v5e/v6e, 64 MiB on v7x).
    vmem_cap = _vmem_capacity_bytes()
    vmem_limit = max(24 * (1 << 20), min((vmem_cap * 5) // 8, vmem_cap - (8 << 20)))
    budget = (vmem_limit * 3) // 5          # headroom for DMA buffers / compiler scratch

    in_bytes = jnp.dtype(pred.dtype).itemsize
    # 2 inputs x 2 pipeline buffers + frame & ~live f32 intermediates (estimate).
    per_image = 4 * H * W * in_bytes + 12 * Hf * Wf * 4
    tb_cap = int(max(1, min(budget // per_image, 64, N)))
    TB = next(tb for tb in range(tb_cap, 0, -1) if N % tb == 0)   # exact batch blocks
    NB = N // TB
    # TODO(synk): row-strip spatial tiling (4-row halo) when per_image > budget
    # even at TB == 1 (HD/4K frames); also lets v7x megacore help when N == 1.

    partial = pl.pallas_call(
        _make_sobel_kernel(H, W),
        out_shape=jax.ShapeDtypeStruct((NB, 1, 1), jnp.float32),
        grid_spec=pltpu.PrefetchScalarGridSpec(
            num_scalar_prefetch=0,
            grid=(NB,),
            in_specs=[pl.BlockSpec((TB, H, W), lambda i: (i, 0, 0)),
                      pl.BlockSpec((TB, H, W), lambda i: (i, 0, 0))],
            out_specs=pl.BlockSpec((1, 1, 1), lambda i: (i, 0, 0)),
            scratch_shapes=[pltpu.VMEM((TB, Hf, Wf), jnp.float32)],
        ),
        compiler_params=pltpu.CompilerParams(
            dimension_semantics=("parallel",),
            vmem_limit_bytes=int(vmem_limit)),
    )(p, t)

    total = jnp.sum(partial)
    if reduction == 'mean':
        total = total / (N * C * H * W)
    return loss_weight * total


def sobel_loss_ref(pred, target, loss_weight=1.0):
    """Pure-JAX reference mirroring the PyTorch forward (reduction='mean', weight=None)."""
    k3x = jnp.asarray(K3X, jnp.float32)[None, None]
    k3y = jnp.swapaxes(k3x, -1, -2)
    k5x = jnp.asarray(K5X, jnp.float32)[None, None]
    k5y = jnp.swapaxes(k5x, -1, -2)

    def conv(x, k, p):
        return lax.conv_general_dilated(
            x, k, window_strides=(1, 1), padding=[(p, p), (p, p)],
            dimension_numbers=('NCHW', 'OIHW', 'NCHW'))

    loss = (jnp.mean(jnp.abs(conv(pred, k3x, 1) - conv(target, k3x, 1)))
            + jnp.mean(jnp.abs(conv(pred, k3y, 1) - conv(target, k3y, 1)))
            + jnp.mean(jnp.abs(conv(pred, k5x, 2) - conv(target, k5x, 2)))
            + jnp.mean(jnp.abs(conv(pred, k5y, 2) - conv(target, k5y, 2))))
    return loss_weight * loss


if __name__ == "__main__":
    key = jax.random.PRNGKey(0)
    k1, k2 = jax.random.split(key)
    N, C, H, W = 2, 1, 16, 16
    pred = jax.random.normal(k1, (N, C, H, W), dtype=jnp.float32)
    target = jax.random.normal(k2, (N, C, H, W), dtype=jnp.float32)

    loss = jax.block_until_ready(jax.jit(sobel_loss_pallas)(pred, target))
    ref = jax.block_until_ready(sobel_loss_ref(pred, target))
    assert jnp.allclose(loss, ref, rtol=1e-4, atol=1e-4), (loss, ref)

    print("KERNEL_OK")
</pallas_src>

<mosaic_0001>
module attributes {stable_mosaic.version = 11 : i64} {
  func.func @kernel(%arg0: i32, %arg1: memref<2x16x16xf32, #tpu.memory_space<vmem>>, %arg2: memref<2x16x16xf32, #tpu.memory_space<vmem>>, %arg3: memref<1x1x1xf32, #tpu.memory_space<vmem>>, %arg4: memref<2x24x128xf32, #tpu.memory_space<vmem>>) attributes {dimension_semantics = [#tpu.dimension_semantics<parallel>], iteration_bounds = array<i64: 1>, scalar_prefetch = 0 : i64, scratch_operands = 1 : i64, tpu.core_type = #tpu.core_type<tc>, window_params = [{transform_indices = @transform_0, window_bounds = array<i64: 2, 16, 16>}, {transform_indices = @transform_1, window_bounds = array<i64: 2, 16, 16>}, {transform_indices = @transform_2, window_bounds = array<i64: 1, 1, 1>}]} {
    %cst = arith.constant 0.000000e+00 : f32
    %0 = vector.broadcast %cst : f32 to vector<2x24x128xf32>
    %c0 = arith.constant 0 : index
    %c0_0 = arith.constant 0 : index
    %c0_1 = arith.constant 0 : index
    %1 = vector.load %arg4[%c0, %c0_0, %c0_1] : memref<2x24x128xf32, #tpu.memory_space<vmem>>, vector<2x24x128xf32>
    tpu.vector_store %arg4[%c0, %c0_0, %c0_1], %0 {strides = array<i32>} : memref<2x24x128xf32, #tpu.memory_space<vmem>>, vector<2x24x128xf32>,
    %c0_2 = arith.constant 0 : index
    %c0_3 = arith.constant 0 : index
    %c0_4 = arith.constant 0 : index
    %2 = vector.load %arg1[%c0_2, %c0_3, %c0_4] : memref<2x16x16xf32, #tpu.memory_space<vmem>>, vector<2x16x16xf32>
    %c0_5 = arith.constant 0 : index
    %c0_6 = arith.constant 0 : index
    %c0_7 = arith.constant 0 : index
    %3 = vector.load %arg2[%c0_5, %c0_6, %c0_7] : memref<2x16x16xf32, #tpu.memory_space<vmem>>, vector<2x16x16xf32>
    %4 = arith.subf %2, %3 : vector<2x16x16xf32>
    %c0_8 = arith.constant 0 : index
    %c2 = arith.constant 2 : index
    %c2_9 = arith.constant 2 : index
    %5 = vector.load %arg4[%c0_8, %c2, %c2_9] : memref<2x24x128xf32, #tpu.memory_space<vmem>>, vector<2x16x16xf32>
    tpu.vector_store %arg4[%c0_8, %c2, %c2_9], %4 {strides = array<i32>} : memref<2x24x128xf32, #tpu.memory_space<vmem>>, vector<2x16x16xf32>,
    %c0_10 = arith.constant 0 : index
    %c0_11 = arith.constant 0 : index
    %c0_12 = arith.constant 0 : index
    %6 = vector.load %arg4[%c0_10, %c0_11, %c0_12] : memref<2x24x128xf32, #tpu.memory_space<vmem>>, vector<2x24x128xf32>
    %c1_i32 = arith.constant 1 : i32
    %7 = tpu.dynamic_rotate %6 by %c1_i32 dim 1 : vector<2x24x128xf32>, i32 -> vector<2x24x128xf32>
    %c23_i32 = arith.constant 23 : i32
    %8 = tpu.dynamic_rotate %6 by %c23_i32 dim 1 : vector<2x24x128xf32>, i32 -> vector<2x24x128xf32>
    %c2_i32 = arith.constant 2 : i32
    %9 = tpu.dynamic_rotate %6 by %c2_i32 dim 1 : vector<2x24x128xf32>, i32 -> vector<2x24x128xf32>
    %c22_i32 = arith.constant 22 : i32
    %10 = tpu.dynamic_rotate %6 by %c22_i32 dim 1 : vector<2x24x128xf32>, i32 -> vector<2x24x128xf32>
    %11 = arith.addf %7, %8 : vector<2x24x128xf32>
    %12 = arith.addf %9, %10 : vector<2x24x128xf32>
    %13 = arith.subf %8, %7 : vector<2x24x128xf32>
    %14 = arith.subf %9, %10 : vector<2x24x128xf32>
    %cst_13 = arith.constant 2.000000e+00 : f32
    %15 = vector.broadcast %cst_13 : f32 to vector<2x24x128xf32>
    %16 = arith.mulf %15, %6 : vector<2x24x128xf32>
    %17 = arith.addf %11, %16 : vector<2x24x128xf32>
    %cst_14 = arith.constant 4.000000e+00 : f32
    %18 = vector.broadcast %cst_14 : f32 to vector<2x24x128xf32>
    %19 = arith.mulf %18, %11 : vector<2x24x128xf32>
    %20 = arith.addf %12, %19 : vector<2x24x128xf32>
    %cst_15 = arith.constant 6.000000e+00 : f32
    %21 = vector.broadcast %cst_15 : f32 to vector<2x24x128xf32>
    %22 = arith.mulf %21, %6 : vector<2x24x128xf32>
    %23 = arith.addf %20, %22 : vector<2x24x128xf32>
    %cst_16 = arith.constant 2.000000e+00 : f32
    %24 = vector.broadcast %cst_16 : f32 to vector<2x24x128xf32>
    %25 = arith.mulf %24, %13 : vector<2x24x128xf32>
    %26 = arith.subf %14, %25 : vector<2x24x128xf32>
    %c127_i32 = arith.constant 127 : i32
    %27 = tpu.dynamic_rotate %17 by %c127_i32 dim 2 : vector<2x24x128xf32>, i32 -> vector<2x24x128xf32>
    %c1_i32_17 = arith.constant 1 : i32
    %28 = tpu.dynamic_rotate %17 by %c1_i32_17 dim 2 : vector<2x24x128xf32>, i32 -> vector<2x24x128xf32>
    %29 = arith.subf %27, %28 : vector<2x24x128xf32>
    %30 = math.absf %29 : vector<2x24x128xf32>
    %c1_i32_18 = arith.constant 1 : i32
    %31 = tpu.dynamic_rotate %13 by %c1_i32_18 dim 2 : vector<2x24x128xf32>, i32 -> vector<2x24x128xf32>
    %cst_19 = arith.constant 2.000000e+00 : f32
    %32 = vector.broadcast %cst_19 : f32 to vector<2x24x128xf32>
    %33 = arith.mulf %32, %13 : vector<2x24x128xf32>
    %34 = arith.addf %31, %33 : vector<2x24x128xf32>
    %c127_i32_20 = arith.constant 127 : i32
    %35 = tpu.dynamic_rotate %13 by %c127_i32_20 dim 2 : vector<2x24x128xf32>, i32 -> vector<2x24x128xf32>
    %36 = arith.addf %34, %35 : vector<2x24x128xf32>
    %37 = math.absf %36 : vector<2x24x128xf32>
    %38 = arith.addf %30, %37 : vector<2x24x128xf32>
    %c2_i32_21 = arith.constant 2 : i32
    %39 = tpu.dynamic_rotate %23 by %c2_i32_21 dim 2 : vector<2x24x128xf32>, i32 -> vector<2x24x128xf32>
    %c126_i32 = arith.constant 126 : i32
    %40 = tpu.dynamic_rotate %23 by %c126_i32 dim 2 : vector<2x24x128xf32>, i32 -> vector<2x24x128xf32>
    %41 = arith.subf %39, %40 : vector<2x24x128xf32>
    %c1_i32_22 = arith.constant 1 : i32
    %42 = tpu.dynamic_rotate %23 by %c1_i32_22 dim 2 : vector<2x24x128xf32>, i32 -> vector<2x24x128xf32>
    %c127_i32_23 = arith.constant 127 : i32
    %43 = tpu.dynamic_rotate %23 by %c127_i32_23 dim 2 : vector<2x24x128xf32>, i32 -> vector<2x24x128xf32>
    %44 = arith.subf %42, %43 : vector<2x24x128xf32>
    %cst_24 = arith.constant 2.000000e+00 : f32
    %45 = vector.broadcast %cst_24 : f32 to vector<2x24x128xf32>
    %46 = arith.mulf %45, %44 : vector<2x24x128xf32>
    %47 = arith.addf %41, %46 : vector<2x24x128xf32>
    %48 = math.absf %47 : vector<2x24x128xf32>
    %49 = arith.addf %38, %48 : vector<2x24x128xf32>
    %c2_i32_25 = arith.constant 2 : i32
    %50 = tpu.dynamic_rotate %26 by %c2_i32_25 dim 2 : vector<2x24x128xf32>, i32 -> vector<2x24x128xf32>
    %c126_i32_26 = arith.constant 126 : i32
    %51 = tpu.dynamic_rotate %26 by %c126_i32_26 dim 2 : vector<2x24x128xf32>, i32 -> vector<2x24x128xf32>
    %52 = arith.addf %50, %51 : vector<2x24x128xf32>
    %c1_i32_27 = arith.constant 1 : i32
    %53 = tpu.dynamic_rotate %26 by %c1_i32_27 dim 2 : vector<2x24x128xf32>, i32 -> vector<2x24x128xf32>
    %c127_i32_28 = arith.constant 127 : i32
    %54 = tpu.dynamic_rotate %26 by %c127_i32_28 dim 2 : vector<2x24x128xf32>, i32 -> vector<2x24x128xf32>
    %55 = arith.addf %53, %54 : vector<2x24x128xf32>
    %cst_29 = arith.constant 4.000000e+00 : f32
    %56 = vector.broadcast %cst_29 : f32 to vector<2x24x128xf32>
    %57 = arith.mulf %56, %55 : vector<2x24x128xf32>
    %58 = arith.addf %52, %57 : vector<2x24x128xf32>
    %cst_30 = arith.constant 6.000000e+00 : f32
    %59 = vector.broadcast %cst_30 : f32 to vector<2x24x128xf32>
    %60 = arith.mulf %59, %26 : vector<2x24x128xf32>
    %61 = arith.addf %58, %60 : vector<2x24x128xf32>
    %62 = math.absf %61 : vector<2x24x128xf32>
    %63 = arith.addf %49, %62 : vector<2x24x128xf32>
    %64 = tpu.iota {dimensions = array<i32: 1>} : vector<2x24x128xi32>
    %65 = tpu.iota {dimensions = array<i32: 2>} : vector<2x24x128xi32>
    %c2_i32_31 = arith.constant 2 : i32
    %66 = vector.broadcast %c2_i32_31 : i32 to vector<2x24x128xi32>
    %67 = arith.cmpi sge, %64, %66 : vector<2x24x128xi32>
    %c18_i32 = arith.constant 18 : i32
    %68 = vector.broadcast %c18_i32 : i32 to vector<2x24x128xi32>
    %69 = arith.cmpi slt, %64, %68 : vector<2x24x128xi32>
    %70 = arith.andi %67, %69 : vector<2x24x128xi1>
    %c2_i32_32 = arith.constant 2 : i32
    %71 = vector.broadcast %c2_i32_32 : i32 to vector<2x24x128xi32>
    %72 = arith.cmpi sge, %65, %71 : vector<2x24x128xi32>
    %73 = arith.andi %70, %72 : vector<2x24x128xi1>
    %c18_i32_33 = arith.constant 18 : i32
    %74 = vector.broadcast %c18_i32_33 : i32 to vector<2x24x128xi32>
    %75 = arith.cmpi slt, %65, %74 : vector<2x24x128xi32>
    %76 = arith.andi %73, %75 : vector<2x24x128xi1>
    %cst_34 = arith.constant 0.000000e+00 : f32
    %77 = vector.broadcast %cst_34 : f32 to vector<2x24x128xf32>
    %78 = arith.select %76, %63, %77 : vector<2x24x128xi1>, vector<2x24x128xf32>
    %79 = vector.shape_cast %78 : vector<2x24x128xf32> to vector<1x2x24x128xf32>
    %cst_35 = arith.constant dense<0.000000e+00> : vector<1xf32>
    %80 = vector.multi_reduction <add>, %79, %cst_35 [1, 2, 3] : vector<1x2x24x128xf32> to vector<1xf32>
    %81 = vector.shape_cast %80 : vector<1xf32> to vector<1x1x1x1xf32>
    %82 = vector.extract %81[0, 0, 0, 0] : f32 from vector<1x1x1x1xf32>
    %83 = vector.broadcast %82 : f32 to vector<1x1x1xf32>
    %c0_36 = arith.constant 0 : index
    %c0_37 = arith.constant 0 : index
    %c0_38 = arith.constant 0 : index
    %84 = vector.load %arg3[%c0_36, %c0_37, %c0_38] : memref<1x1x1xf32, #tpu.memory_space<vmem>>, vector<1x1x1xf32>
    tpu.vector_store %arg3[%c0_36, %c0_37, %c0_38], %83 {strides = array<i32>} : memref<1x1x1xf32, #tpu.memory_space<vmem>>, vector<1x1x1xf32>,
    return
  }
  func.func @transform_0(%arg0: i32) -> (i32, i32, i32) {
    %c0_i32 = arith.constant 0 : i32
    %c0_i32_0 = arith.constant 0 : i32
    %c0_i32_1 = arith.constant 0 : i32
    return %arg0, %c0_i32, %c0_i32_0 : i32, i32, i32
  }
  func.func @transform_1(%arg0: i32) -> (i32, i32, i32) {
    %c0_i32 = arith.constant 0 : i32
    %c0_i32_0 = arith.constant 0 : i32
    %c0_i32_1 = arith.constant 0 : i32
    return %arg0, %c0_i32, %c0_i32_0 : i32, i32, i32
  }
  func.func @transform_2(%arg0: i32) -> (i32, i32, i32) {
    %c0_i32 = arith.constant 0 : i32
    %c0_i32_0 = arith.constant 0 : i32
    %c0_i32_1 = arith.constant 0 : i32
    return %arg0, %c0_i32, %c0_i32_0 : i32, i32, i32
  }
}

</mosaic_0001>

<bundles_post_ra>
// kernel: sobel_loss_pallas.1
= control target key start
LH: loop header
LB: loop body
LE: loop exit
PB: predicated region body
PF: predicated region fallthrough
CT: control target
= control target key end

     0   :  { %7 = vsyncpa [#allocation4], 0  ;;  %s1097_s0 = inlined_call_operand.hbm [shape: f32[2,16,16], index: 0, kind: input, shape index: {}]   ;;  %s1098_s1 = inlined_call_operand.hbm [shape: f32[2,16,16], index: 1, kind: input, shape index: {}]   ;;  %s1099_s2 = inlined_call_operand.hbm [shape: f32[1,1,1], index: 2, kind: output, shape index: {}]  }
   0x1   :  { %8 = vsyncpa [#allocation7], 0 }
   0x2   :  { %9 = vsyncpa [#allocation5], 0  ;;  %s14_s11 = sshll.u32 %s1097_s0, 4  ;;  %s631_s12 = smov [#allocation3]   ;;  %s15_s11 = int_to_ptr.hbm [resolvable:$true] %s14_s11 }
   0x3   :  { %s16_s13 = sshll.u32 %s631_s12, 4  ;;  %s27_s16 = sshll.u32 %s1098_s1, 4  ;;  %s17_s13 = int_to_ptr.vmem [resolvable:$true] %s16_s13  ;;  %s28_s16 = int_to_ptr.hbm [resolvable:$true] %s27_s16 }
   0x4   :  { %s632_s17 = smov 128   ;;  %s633_s18 = smov 8  }
   0x5   :  { %22 = dma.hbm_to_vmem [thread:$0]  %s15_s11, 512, %s17_s13, [#allocation4], %s632_s17, %s632_s17, %s633_s18  }
   0x6   :  { %s634_s19 = smov [#allocation6]  }
   0x7   :  { %s29_s20 = sshll.u32 %s634_s19, 4  ;;  %s30_s20 = int_to_ptr.vmem [resolvable:$true] %s29_s20 }
   0x8   :  { %35 = dma.hbm_to_vmem [thread:$0]  %s28_s16, 512, %s30_s20, [#allocation7], %s632_s17, %s632_s17, %s633_s18  }
   0x9   :  { %625 = dma.done.wait [#allocation4], 512  }
   0xa   :  { %626 = vsyncadd [#allocation4], 4294966784 }
   0xb   :  { %627 = dma.done.wait [#allocation7], 512  }
   0xc   :  { %628 = vsyncadd [#allocation7], 4294966784  ;;  %v635_v0 = vmov 0.0   ;;  %v52_v1 = vld [vmem:[#allocation3 + $0x10] sm:$0xff]  ;;  %v50_v3 = vld [vmem:[#allocation3] sm:$0xff]  ;;  %s636_s0 = smov 2   ;;  %v95_v17 = vlaneseq }
   0xd   :  { %47 = vst [vmem:[#allocation2 + $0x18] sm:$0xff] %v635_v0  ;;  %v56_v2 = vld [vmem:[#allocation6 + $0x10] sm:$0xff]  ;;  %v54_v5 = vld [vmem:[#allocation6] sm:$0xff]  ;;  %v53_v7 = vld [vmem:[#allocation3 + $0x18] sm:$0xff]  ;;  %vm78_vm0 = vcmask 146448   ;;  %s637_s1 = smov 1  }
   0xe   :  { %48 = vst [vmem:[#allocation2 + $0x20] sm:$0xff] %v635_v0  ;;  %v60_v4 = vsub.f32 %v52_v1, %v56_v2  ;;  %v58_v6 = vsub.f32 %v50_v3, %v54_v5  ;;  %v57_v8 = vld [vmem:[#allocation6 + $0x18] sm:$0xff]  ;;  %v51_v9 = vld [vmem:[#allocation3 + $0x8] sm:$0xff]  ;;  %v667_v18 = vshrl.u32 %v95_v17, 7  ;;  %s638_s21 = smov 127   ;;  %s639_s22 = smov 126  }
   0xf   :  { %44 = vst [vmem:[#allocation2] sm:$0xff] %v635_v0  ;;  %v55_v10 = vld [vmem:[#allocation6 + $0x8] sm:$0xff]  ;;  %v61_v11 = vsub.f32 %v53_v7, %v57_v8  ;;  %s530_s25 = sshll.u32 %s1099_s2, 4  ;;  %s640_s26 = smov [#allocation8]   ;;  %vm521_vm14 = vcmask 0   ;;  %s531_s25 = int_to_ptr.hbm [resolvable:$true] %s530_s25 }
  0x10   :  { %45 = vst [vmem:[#allocation2 + $0x8] sm:$0xff] %v635_v0  ;;  %70 = vrot.lane.b32.xlu1 %v60_v4, %s636_s0  ;;  %66 = vrot.lane.b32.xlu0 %v58_v6, %s636_s0  ;;  %v59_v12 = vsub.f32 %v51_v9, %v55_v10  ;;  %vm97_vm1 = vcmp.lt.s32.totalorder %v667_v18, 1  ;;  %vm110_vm2 = vcmp.lt.s32.totalorder %v667_v18, 7  ;;  %vm123_vm3 = vcmp.lt.s32.totalorder %v667_v18, 2  ;;  %s528_s27 = sshll.u32 %s640_s26, 4  ;;  %s529_s27 = int_to_ptr.vmem [resolvable:$true] %s528_s27 }
  0x11   :  { %46 = vst [vmem:[#allocation2 + $0x10] sm:$0xff] %v635_v0  ;;  %vm136_vm4 = vcmp.lt.s32.totalorder %v667_v18, 6  ;;  %vm483_vm5 = vcmp.ge.s32.totalorder %v667_v18, 2 }
  0x12   :  { %49 = vst [vmem:[#allocation2 + $0x28] sm:$0xff] %v635_v0 }
  0x18   :  { %72 = vrot.lane.b32.xlu1 %v61_v11, %s636_s0  ;;  %68 = vrot.lane.b32.xlu0 %v59_v12, %s636_s0 }
  0x82   :  { %v71_v13 = vpop.permute.xlu1 %70  ;;  %v67_v14 = vpop.permute.xlu0 %66 }
  0x83   :  { %81 = vst.msk [vmem:[#allocation2 + $0x1a] sm:$0xff] %vm78_vm0, %v71_v13 }
  0x84   :  { %79 = vst.msk [vmem:[#allocation2 + $0x2] sm:$0xff] %vm78_vm0, %v67_v14 }
  0x8a   :  { %v73_v15 = vpop.permute.xlu1 %72  ;;  %v69_v16 = vpop.permute.xlu0 %68  ;;  %v671_v20 = vld [vmem:[#allocation2 + $0x18] sm:$0xff] }
  0x8b   :  { %82 = vst.msk [vmem:[#allocation2 + $0x22] sm:$0xff] %vm78_vm0, %v73_v15  ;;  %v669_v19 = vld [vmem:[#allocation2] sm:$0xff]  ;;  %v105_v32 = vrot.slane %v671_v20, 1  ;;  %v90_v43 = vrot.slane %v671_v20, 7  ;;  %v118_v48 = vrot.slane %v671_v20, 6  ;;  %v131_v49 = vrot.slane %v671_v20, 2 }
  0x8c   :  { %80 = vst.msk [vmem:[#allocation2 + $0xa] sm:$0xff] %vm78_vm0, %v69_v16  ;;  %v104_v24 = vrot.slane %v669_v19, 1  ;;  %v89_v29 = vrot.slane %v669_v19, 7  ;;  %v130_v3 = vrot.slane %v669_v19, 2 }
  0x92   :  { %v673_v21 = vld [vmem:[#allocation2 + $0x20] sm:$0xff]  ;;  %v682_v25 = vld [vmem:[#allocation2 + $0x28] sm:$0xff] }
  0x93   :  { %v675_v22 = vld [vmem:[#allocation2 + $0x8] sm:$0xff]  ;;  %v677_v23 = vld [vmem:[#allocation2 + $0x10] sm:$0xff]  ;;  %v92_v31 = vrot.slane %v673_v21, 7  ;;  %v94_v36 = vrot.slane %v682_v25, 7  ;;  %v109_v40 = vrot.slane %v682_v25, 1  ;;  %v107_v44 = vrot.slane %v673_v21, 1 }
  0x94   :  { %v91_v26 = vrot.slane %v675_v22, 7  ;;  %v93_v27 = vrot.slane %v677_v23, 7  ;;  %v108_v28 = vrot.slane %v677_v23, 1  ;;  %v106_v30 = vrot.slane %v675_v22, 1 }
  0x95   :  { %v99_v46 = vsel %vm97_vm1, %v92_v31, %v94_v36  ;;  %v116_v47 = vsel %vm110_vm2, %v109_v40, %v105_v32  ;;  %v103_v50 = vsel %vm97_vm1, %v94_v36, %v90_v43  ;;  %v114_v51 = vsel %vm110_vm2, %v105_v32, %v107_v44 }
  0x96   :  { %v98_v33 = vsel %vm97_vm1, %v91_v26, %v93_v27  ;;  %v115_v34 = vsel %vm110_vm2, %v108_v28, %v104_v24  ;;  %v697_v35 = vsel %vm97_vm1, %v93_v27, %v89_v29  ;;  %v704_v38 = vsel %vm110_vm2, %v104_v24, %v106_v30 }
  0x97   :  { %v700_v37 = vsub.f32 %v115_v34, %v98_v33  ;;  %v708_v39 = vsel %vm97_vm1, %v89_v29, %v91_v26  ;;  %v713_v41 = vsub.f32 %v704_v38, %v697_v35  ;;  %v719_v42 = vsel %vm110_vm2, %v106_v30, %v108_v28 }
  0x98   :  { %v727_v45 = vsub.f32 %v719_v42, %v708_v39  ;;  %v122_v52 = vrot.slane %v682_v25, 6  ;;  %v133_v53 = vrot.slane %v673_v21, 2  ;;  %v745_v54 = vsub.f32 %v116_v47, %v99_v46 }
  0x99   :  { %255 = vrot.lane.b32.xlu0 %v700_v37, %s637_s1  ;;  %251 = vrot.lane.b32.xlu1 %v713_v41, %s637_s1  ;;  %v101_v57 = vsel %vm97_vm1, %v90_v43, %v92_v31  ;;  %v112_v58 = vsel %vm110_vm2, %v107_v44, %v109_v40  ;;  %v759_v59 = vsub.f32 %v114_v51, %v103_v50  ;;  %v119_v61 = vrot.slane %v675_v22, 6 }
  0x9a   :  { %253 = vrot.lane.b32.xlu2 %v727_v45, %s637_s1  ;;  %v749_v55 = vsel %vm123_vm3, %v122_v52, %v118_v48  ;;  %v753_v56 = vsel %vm136_vm4, %v131_v49, %v133_v53  ;;  %v121_v62 = vrot.slane %v677_v23, 6  ;;  %v134_v63 = vrot.slane %v677_v23, 2 }
  0x9b   :  { %v164_v60 = vsub.f32 %v749_v55, %v753_v56  ;;  %v770_v0 = vsub.f32 %v112_v58, %v101_v57  ;;  %v145_v1 = vadd.f32 %v115_v34, %v98_v33  ;;  %v146_v2 = vadd.f32 %v114_v51, %v103_v50 }
  0x9c   :  { %v147_v4 = vadd.f32 %v112_v58, %v101_v57  ;;  %v781_v5 = vsel %vm123_vm3, %v119_v61, %v121_v62  ;;  %v789_v6 = vsel %vm136_vm4, %v134_v63, %v130_v3  ;;  %v148_v7 = vadd.f32 %v116_v47, %v99_v46 }
  0x9d   :  { %v120_v8 = vrot.slane %v673_v21, 6  ;;  %v181_v9 = vmul.f32 4.0, %v145_v1  ;;  %v182_v10 = vmul.f32 4.0, %v146_v2  ;;  %v135_v11 = vrot.slane %v682_v25, 2 }
  0x9e   :  { %v183_v12 = vmul.f32 4.0, %v147_v4  ;;  %v151_v15 = vadd.f32 %v789_v6, %v781_v5  ;;  %v152_v16 = vadd.f32 %v753_v56, %v749_v55  ;;  %v184_v26 = vmul.f32 4.0, %v148_v7 }
  0x9f   :  { %v795_v13 = vsel %vm123_vm3, %v118_v48, %v120_v8  ;;  %v799_v14 = vsel %vm136_vm4, %v133_v53, %v135_v11  ;;  %v807_v24 = vsel %vm123_vm3, %v120_v8, %v122_v52  ;;  %v194_v29 = vmul.f32 6.0, %v671_v20 }
  0xa0   :  { %v153_v27 = vadd.f32 %v799_v14, %v795_v13  ;;  %v165_v28 = vsub.f32 %v795_v13, %v799_v14  ;;  %v187_v30 = vadd.f32 %v181_v9, %v151_v15  ;;  %v193_v31 = vmul.f32 6.0, %v677_v23 }
  0xa1   :  { %261 = vrot.lane.b32.xlu0 %v745_v54, %s637_s1  ;;  %257 = vrot.lane.b32.xlu1 %v759_v59, %s637_s1  ;;  %v188_v32 = vadd.f32 %v182_v10, %v152_v16  ;;  %v821_v33 = vsel %vm136_vm4, %v135_v11, %v131_v49  ;;  %v195_v46 = vmul.f32 6.0, %v673_v21  ;;  %v196_v47 = vmul.f32 6.0, %v682_v25 }
  0xa2   :  { %259 = vrot.lane.b32.xlu2 %v770_v0, %s637_s1  ;;  %v154_v34 = vadd.f32 %v821_v33, %v807_v24  ;;  %v166_v36 = vsub.f32 %v807_v24, %v821_v33  ;;  %v189_v40 = vadd.f32 %v183_v12, %v153_v27  ;;  %v829_v43 = vadd.f32 %v193_v31, %v187_v30 }
  0xa3   :  { %v831_v44 = vadd.f32 %v194_v29, %v188_v32  ;;  %v169_v48 = vmul.f32 2.0, %v677_v23  ;;  %v143_v50 = vadd.f32 %v704_v38, %v697_v35  ;;  %v167_v57 = vmul.f32 2.0, %v669_v19 }
  0xa4   :  { %v190_v49 = vadd.f32 %v184_v26, %v154_v34  ;;  %v838_v51 = vadd.f32 %v195_v46, %v189_v40  ;;  %v172_v8 = vmul.f32 2.0, %v682_v25  ;;  %v170_v9 = vmul.f32 2.0, %v671_v20 }
  0xa5   :  { %v175_v52 = vadd.f32 %v169_v48, %v145_v1  ;;  %v173_v58 = vadd.f32 %v167_v57, %v143_v50  ;;  %v144_v35 = vadd.f32 %v719_v42, %v708_v39  ;;  %v168_v10 = vmul.f32 2.0, %v675_v22 }
  0xa6   :  { %v840_v53 = vadd.f32 %v196_v47, %v190_v49  ;;  %v178_v38 = vadd.f32 %v172_v8, %v148_v7  ;;  %v176_v1 = vadd.f32 %v170_v9, %v146_v2  ;;  %v171_v25 = vmul.f32 2.0, %v673_v21 }
  0xa7   :  { %v174_v11 = vadd.f32 %v168_v10, %v144_v35  ;;  %v132_v39 = vrot.slane %v675_v22, 2  ;;  %v117_v42 = vrot.slane %v669_v19, 6  ;;  %v204_v12 = vmul.f32 2.0, %v727_v45 }
  0xa8   :  { %v177_v20 = vadd.f32 %v171_v25, %v147_v4  ;;  %v872_v4 = vmul.f32 2.0, %v713_v41  ;;  %v205_v23 = vmul.f32 2.0, %v700_v37  ;;  %v179_v27 = vmul.f32 4.0, %v143_v50 }
  0xa9   :  { %273 = vrot.lane.b32.xlu0 %v700_v37, %s638_s21  ;;  %269 = vrot.lane.b32.xlu1 %v713_v41, %s638_s21  ;;  %v128_v2 = vsel %vm123_vm3, %v121_v62, %v117_v42  ;;  %v139_v21 = vsel %vm136_vm4, %v130_v3, %v132_v39  ;;  %v126_v7 = vsel %vm123_vm3, %v117_v42, %v119_v61 }
  0xaa   :  { %271 = vrot.lane.b32.xlu2 %v727_v45, %s638_s21  ;;  %v137_v62 = vsel %vm136_vm4, %v132_v39, %v134_v63  ;;  %v161_v3 = vsub.f32 %v128_v2, %v139_v21  ;;  %v206_v45 = vmul.f32 2.0, %v759_v59  ;;  %v163_v61 = vsub.f32 %v781_v5, %v789_v6 }
  0xab   :  { %v162_v15 = vsub.f32 %v126_v7, %v137_v62  ;;  %v149_v37 = vadd.f32 %v139_v21, %v128_v2  ;;  %v191_v5 = vmul.f32 6.0, %v669_v19  ;;  %v180_v6 = vmul.f32 4.0, %v144_v35 }
  0xac   :  { %v885_v16 = vsub.f32 %v161_v3, %v872_v4  ;;  %v910_v63 = vsub.f32 %v163_v61, %v205_v23  ;;  %v915_v26 = vsub.f32 %v164_v60, %v206_v45  ;;  %v150_v55 = vadd.f32 %v137_v62, %v126_v7 }
  0xad   :  { %v887_v41 = vsub.f32 %v162_v15, %v204_v12  ;;  %v192_v60 = vmul.f32 6.0, %v675_v22 }
  0xae   :  { %v186_v56 = vadd.f32 %v180_v6, %v150_v55 }
  0xb0   :  { %v198_v31 = vadd.f32 %v192_v60, %v186_v56 }
  0xb1   :  { %219 = vrot.lane.b32.xlu0 %v175_v52, %s638_s21  ;;  %275 = vrot.lane.b32.xlu1 %v759_v59, %s638_s21  ;;  %v185_v59 = vadd.f32 %v179_v27, %v149_v37 }
  0xb2   :  { %215 = vrot.lane.b32.xlu2 %v173_v58, %s638_s21 }
  0xb3   :  { %v197_v29 = vadd.f32 %v191_v5, %v185_v59 }
  0xb9   :  { %225 = vrot.lane.b32.xlu0 %v178_v38, %s638_s21  ;;  %221 = vrot.lane.b32.xlu1 %v176_v1, %s638_s21 }
  0xba   :  { %217 = vrot.lane.b32.xlu2 %v174_v11, %s638_s21 }
  0xc1   :  { %231 = vrot.lane.b32.xlu0 %v175_v52, %s637_s1  ;;  %227 = vrot.lane.b32.xlu1 %v173_v58, %s637_s1 }
  0xc2   :  { %223 = vrot.lane.b32.xlu2 %v177_v20, %s638_s21 }
  0xc9   :  { %237 = vrot.lane.b32.xlu0 %v178_v38, %s637_s1  ;;  %233 = vrot.lane.b32.xlu1 %v176_v1, %s637_s1  ;;  %v965_v1 = vmul.f32 2.0, %v770_v0 }
  0xca   :  { %229 = vrot.lane.b32.xlu2 %v174_v11, %s637_s1 }
  0xcb   :  { %v973_v39 = vsub.f32 %v165_v28, %v965_v1 }
  0xd1   :  { %413 = vrot.lane.b32.xlu0 %v885_v16, %s637_s1  ;;  %415 = vrot.lane.b32.xlu1 %v887_v41, %s637_s1 }
  0xd2   :  { %235 = vrot.lane.b32.xlu2 %v177_v20, %s637_s1 }
  0xd9   :  { %427 = vrot.lane.b32.xlu0 %v887_v41, %s638_s21  ;;  %383 = vrot.lane.b32.xlu1 %v885_v16, %s636_s0 }
  0xda   :  { %425 = vrot.lane.b32.xlu2 %v885_v16, %s638_s21 }
  0xe1   :  { %395 = vrot.lane.b32.xlu0 %v885_v16, %s639_s22  ;;  %397 = vrot.lane.b32.xlu1 %v887_v41, %s639_s22 }
  0xe2   :  { %385 = vrot.lane.b32.xlu2 %v887_v41, %s636_s0 }
  0xe9   :  { %429 = vrot.lane.b32.xlu0 %v910_v63, %s638_s21  ;;  %419 = vrot.lane.b32.xlu1 %v915_v26, %s637_s1 }
  0xea   :  { %417 = vrot.lane.b32.xlu2 %v910_v63, %s637_s1 }
  0xf1   :  { %399 = vrot.lane.b32.xlu0 %v910_v63, %s639_s22  ;;  %341 = vrot.lane.b32.xlu1 %v197_v29, %s638_s21 }
  0xf2   :  { %387 = vrot.lane.b32.xlu2 %v910_v63, %s636_s0 }
  0xf4   :  { %v254_v30 = vpop.permute.xlu2 %253 }
  0xf5   :  { %v264_v32 = vadd.f32 %v254_v30, %v204_v12 }
  0xf9   :  { %331 = vrot.lane.b32.xlu0 %v198_v31, %s637_s1  ;;  %299 = vrot.lane.b32.xlu1 %v197_v29, %s636_s0 }
  0xfa   :  { %431 = vrot.lane.b32.xlu2 %v915_v26, %s638_s21 }
  0xfc   :  { %v934_v19 = vpop.permute.xlu2 %259 }
 0x101   :  { %311 = vrot.lane.b32.xlu0 %v197_v29, %s639_s22  ;;  %313 = vrot.lane.b32.xlu1 %v198_v31, %s639_s22 }
 0x102   :  { %329 = vrot.lane.b32.xlu2 %v197_v29, %s637_s1 }
 0x104   :  { %v272_v34 = vpop.permute.xlu2 %271 }
 0x105   :  { %v282_v22 = vadd.f32 %v272_v34, %v264_v32 }
 0x107   :  { %v288_v2 = vand.u32 2147483647, %v282_v22 }
 0x109   :  { %345 = vrot.lane.b32.xlu0 %v829_v43, %s638_s21  ;;  %303 = vrot.lane.b32.xlu1 %v829_v43, %s636_s0 }
 0x10a   :  { %343 = vrot.lane.b32.xlu2 %v198_v31, %s638_s21 }
 0x10b   :  { %v256_v40 = vpop.permute.xlu0 %255  ;;  %v252_v46 = vpop.permute.xlu1 %251 }
 0x10c   :  { %v216_v47 = vpop.permute.xlu2 %215  ;;  %v265_v52 = vadd.f32 %v256_v40, %v205_v23  ;;  %v263_v57 = vadd.f32 %v252_v46, %v872_v4 }
 0x111   :  { %335 = vrot.lane.b32.xlu0 %v831_v44, %s637_s1  ;;  %347 = vrot.lane.b32.xlu1 %v831_v44, %s638_s21 }
 0x112   :  { %301 = vrot.lane.b32.xlu2 %v198_v31, %s636_s0 }
 0x113   :  { %v948_v48 = vpop.permute.xlu0 %261  ;;  %v258_v49 = vpop.permute.xlu1 %257 }
 0x114   :  { %v218_v50 = vpop.permute.xlu2 %217 }
 0x119   :  { %305 = vrot.lane.b32.xlu0 %v831_v44, %s636_s0  ;;  %317 = vrot.lane.b32.xlu1 %v831_v44, %s639_s22  ;;  %v266_v44 = vadd.f32 %v258_v49, %v206_v45 }
 0x11a   :  { %333 = vrot.lane.b32.xlu2 %v829_v43, %s637_s1 }
 0x11b   :  { %v274_v58 = vpop.permute.xlu0 %273  ;;  %v270_v9 = vpop.permute.xlu1 %269 }
 0x11c   :  { %v283_v8 = vadd.f32 %v274_v58, %v265_v52  ;;  %v281_v35 = vadd.f32 %v270_v9, %v263_v57  ;;  %v958_v38 = vpop.permute.xlu2 %223 }
 0x11e   :  { %v289_v15 = vand.u32 2147483647, %v283_v8  ;;  %v287_v61 = vand.u32 2147483647, %v281_v35 }
 0x121   :  { %349 = vrot.lane.b32.xlu0 %v838_v51, %s638_s21  ;;  %389 = vrot.lane.b32.xlu1 %v915_v26, %s636_s0 }
 0x122   :  { %315 = vrot.lane.b32.xlu2 %v829_v43, %s639_s22 }
 0x123   :  { %v220_v10 = vpop.permute.xlu0 %219  ;;  %v276_v11 = vpop.permute.xlu1 %275 }
 0x124   :  { %v284_v25 = vadd.f32 %v276_v11, %v266_v44  ;;  %v230_v20 = vpop.permute.xlu2 %229  ;;  %v456_v44 = vmul.f32 6.0, %v887_v41 }
 0x125   :  { %v240_v42 = vsub.f32 %v218_v50, %v230_v20 }
 0x126   :  { %v290_v30 = vand.u32 2147483647, %v284_v25 }
 0x127   :  { %v246_v21 = vand.u32 2147483647, %v240_v42 }
 0x129   :  { %421 = vrot.lane.b32.xlu0 %v973_v39, %s637_s1  ;;  %433 = vrot.lane.b32.xlu1 %v973_v39, %s638_s21  ;;  %v979_v4 = vadd.f32 %v288_v2, %v246_v21 }
 0x12a   :  { %337 = vrot.lane.b32.xlu2 %v838_v51, %s637_s1 }
 0x12b   :  { %v981_v43 = vpop.permute.xlu0 %225  ;;  %v222_v7 = vpop.permute.xlu1 %221 }
 0x12c   :  { %v985_v13 = vpop.permute.xlu2 %235 }
 0x12d   :  { %v243_v14 = vsub.f32 %v958_v38, %v985_v13 }
 0x131   :  { %307 = vrot.lane.b32.xlu0 %v838_v51, %s636_s0  ;;  %319 = vrot.lane.b32.xlu1 %v838_v51, %s639_s22  ;;  %v1004_v51 = vmul.f32 2.0, %v745_v54 }
 0x132   :  { %401 = vrot.lane.b32.xlu2 %v915_v26, %s639_s22 }
 0x133   :  { %v232_v28 = vpop.permute.xlu0 %231  ;;  %v228_v12 = vpop.permute.xlu1 %227  ;;  %v1016_v60 = vsub.f32 %v166_v36, %v1004_v51 }
 0x134   :  { %v241_v62 = vsub.f32 %v220_v10, %v232_v28  ;;  %v239_v3 = vsub.f32 %v216_v47, %v228_v12  ;;  %v426_v45 = vpop.permute.xlu2 %425 }
 0x136   :  { %v247_v23 = vand.u32 2147483647, %v241_v62  ;;  %v245_v27 = vand.u32 2147483647, %v239_v3 }
 0x138   :  { %v995_v37 = vadd.f32 %v289_v15, %v247_v23  ;;  %v997_v59 = vadd.f32 %v287_v61, %v245_v27  ;;  %v482_v61 = vand.u32 127, %v95_v17 }
 0x139   :  { %351 = vrot.lane.b32.xlu0 %v840_v53, %s638_s21  ;;  %391 = vrot.lane.b32.xlu1 %v973_v39, %s636_s0 }
 0x13a   :  { %277 = vrot.lane.b32.xlu2 %v770_v0, %s638_s21  ;;  %vm492_vm6 = vcmp.ge.s32.totalorder %v482_v61, 2  ;;  %vm496_vm8 = vcmp.lt.s32.totalorder %v482_v61, 18  ;;  %v267_v61 = vadd.f32 %v934_v19, %v965_v1 }
 0x13b   :  { %v1006_v5 = vpop.permute.xlu0 %237  ;;  %v234_v29 = vpop.permute.xlu1 %233  ;;  %vm493_vm7 = vmand %vm483_vm5, %vm492_vm6 }
 0x13c   :  { %v244_v6 = vsub.f32 %v981_v43, %v1006_v5  ;;  %v242_v55 = vsub.f32 %v222_v7, %v234_v29  ;;  %v386_v56 = vpop.permute.xlu2 %385  ;;  %vm1048_vm9 = vmand %vm493_vm7, %vm496_vm8 }
 0x13d   :  { %vm1055_vm10 = vmand %vm492_vm6, %vm496_vm8 }
 0x13e   :  { %v248_v31 = vand.u32 2147483647, %v242_v55 }
 0x140   :  { %v1018_v32 = vadd.f32 %v290_v30, %v248_v31 }
 0x141   :  { %423 = vrot.lane.b32.xlu0 %v1016_v60, %s637_s1  ;;  %435 = vrot.lane.b32.xlu1 %v1016_v60, %s638_s21 }
 0x142   :  { %339 = vrot.lane.b32.xlu2 %v840_v53, %s637_s1 }
 0x143   :  { %v414_v0 = vpop.permute.xlu0 %413  ;;  %v416_v22 = vpop.permute.xlu1 %415 }
 0x144   :  { %v437_v34 = vadd.f32 %v426_v45, %v414_v0  ;;  %v418_v40 = vpop.permute.xlu2 %417 }
 0x146   :  { %v443_v49 = vmul.f32 4.0, %v437_v34 }
 0x149   :  { %309 = vrot.lane.b32.xlu0 %v840_v53, %s636_s0  ;;  %321 = vrot.lane.b32.xlu1 %v840_v53, %s639_s22  ;;  %v455_v53 = vmul.f32 6.0, %v885_v16 }
 0x14a   :  { %403 = vrot.lane.b32.xlu2 %v973_v39, %s639_s22 }
 0x14b   :  { %v428_v24 = vpop.permute.xlu0 %427  ;;  %v384_v36 = vpop.permute.xlu1 %383 }
 0x14c   :  { %v438_v33 = vadd.f32 %v428_v24, %v416_v22  ;;  %v388_v46 = vpop.permute.xlu2 %387 }
 0x14e   :  { %v444_v57 = vmul.f32 4.0, %v438_v33 }
 0x151   :  { %405 = vrot.lane.b32.xlu0 %v1016_v60, %s639_s22 }
 0x152   :  { %279 = vrot.lane.b32.xlu2 %v745_v54, %s638_s21 }
 0x153   :  { %v396_v47 = vpop.permute.xlu0 %395  ;;  %v398_v52 = vpop.permute.xlu1 %397 }
 0x154   :  { %v407_v50 = vadd.f32 %v396_v47, %v384_v36  ;;  %v408_v58 = vadd.f32 %v398_v52, %v386_v56  ;;  %v432_v9 = vpop.permute.xlu2 %431 }
 0x156   :  { %v449_v8 = vadd.f32 %v443_v49, %v407_v50  ;;  %v450_v35 = vadd.f32 %v444_v57, %v408_v58  ;;  %v480_v58 = vadd.s32 16, %v667_v18  ;;  %v459_v49 = vmul.f32 6.0, %v973_v39 }
 0x158   :  { %v461_v10 = vadd.f32 %v455_v53, %v449_v8  ;;  %v462_v11 = vadd.f32 %v456_v44, %v450_v35  ;;  %v457_v35 = vmul.f32 6.0, %v910_v63  ;;  %vm488_vm11 = vcmp.lt.s32.totalorder %v480_v58, 18 }
 0x159   :  { %vm495_vm12 = vmand %vm488_vm11, %vm492_vm6 }
 0x15a   :  { %393 = vrot.lane.b32.xlu2 %v1016_v60, %s636_s0  ;;  %v467_v33 = vand.u32 2147483647, %v461_v10  ;;  %v468_v36 = vand.u32 2147483647, %v462_v11  ;;  %vm1067_vm13 = vmand %vm495_vm12, %vm496_vm8 }
 0x15b   :  { %v430_v25 = vpop.permute.xlu0 %429  ;;  %v420_v42 = vpop.permute.xlu1 %419 }
 0x15c   :  { %v439_v20 = vadd.f32 %v430_v25, %v418_v40  ;;  %v1040_v54 = vadd.f32 %v432_v9, %v420_v42  ;;  %v330_v2 = vpop.permute.xlu2 %329 }
 0x15e   :  { %v445_v7 = vmul.f32 4.0, %v439_v20 }
 0x163   :  { %v400_v21 = vpop.permute.xlu0 %399  ;;  %v342_v16 = vpop.permute.xlu1 %341 }
 0x164   :  { %v409_v28 = vadd.f32 %v400_v21, %v388_v46  ;;  %v353_v62 = vsub.f32 %v330_v2, %v342_v16  ;;  %v344_v3 = vpop.permute.xlu2 %343 }
 0x166   :  { %v451_v12 = vadd.f32 %v445_v7, %v409_v28  ;;  %v359_v29 = vmul.f32 2.0, %v353_v62 }
 0x168   :  { %v463_v11 = vadd.f32 %v457_v35, %v451_v12  ;;  %v268_v35 = vadd.f32 %v948_v48, %v1004_v51 }
 0x16a   :  { %v469_v21 = vand.u32 2147483647, %v463_v11 }
 0x16b   :  { %v332_v15 = vpop.permute.xlu0 %331  ;;  %v300_v41 = vpop.permute.xlu1 %299 }
 0x16c   :  { %v354_v23 = vsub.f32 %v332_v15, %v344_v3  ;;  %v302_v45 = vpop.permute.xlu2 %301 }
 0x16e   :  { %v360_v30 = vmul.f32 2.0, %v354_v23 }
 0x173   :  { %v312_v27 = vpop.permute.xlu0 %311  ;;  %v314_v55 = vpop.permute.xlu1 %313 }
 0x174   :  { %v323_v56 = vsub.f32 %v300_v41, %v312_v27  ;;  %v324_v31 = vsub.f32 %v302_v45, %v314_v55  ;;  %v334_v34 = vpop.permute.xlu2 %333 }
 0x176   :  { %v365_v0 = vadd.f32 %v359_v29, %v323_v56  ;;  %v366_v22 = vadd.f32 %v360_v30, %v324_v31  ;;  %v446_v56 = vmul.f32 4.0, %v1040_v54 }
 0x178   :  { %v371_v40 = vand.u32 2147483647, %v365_v0  ;;  %v372_v24 = vand.u32 2147483647, %v366_v22 }
 0x17a   :  { %v377_v17 = vadd.f32 %v371_v40, %v997_v59  ;;  %v378_v46 = vadd.f32 %v372_v24, %v979_v4  ;;  %v249_v24 = vand.u32 2147483647, %v243_v14 }
 0x17b   :  { %v346_v47 = vpop.permute.xlu0 %345  ;;  %v304_v52 = vpop.permute.xlu1 %303 }
 0x17c   :  { %v473_v50 = vadd.f32 %v467_v33, %v377_v17  ;;  %v355_v57 = vsub.f32 %v334_v34, %v346_v47  ;;  %v474_v59 = vadd.f32 %v468_v36, %v378_v46  ;;  %v316_v4 = vpop.permute.xlu2 %315  ;;  %v458_v34 = vmul.f32 6.0, %v915_v26 }
 0x17d   :  { %v325_v44 = vsub.f32 %v304_v52, %v316_v4 }
 0x17e   :  { %v361_v8 = vmul.f32 2.0, %v355_v57  ;;  %v500_v9 = vsel %vm1048_vm9, %v473_v50, 0.0  ;;  %v501_v10 = vsel %vm1055_vm10, %v474_v59, 0.0 }
 0x17f   :  { %v506_v18 = vadd.f32 %v501_v10, %v500_v9 }
 0x180   :  { %v367_v25 = vadd.f32 %v361_v8, %v325_v44 }
 0x182   :  { %v373_v20 = vand.u32 2147483647, %v367_v25 }
 0x183   :  { %v336_v42 = vpop.permute.xlu0 %335  ;;  %v348_v2 = vpop.permute.xlu1 %347 }
 0x184   :  { %v379_v7 = vadd.f32 %v373_v20, %v995_v37  ;;  %v338_v28 = vpop.permute.xlu2 %337  ;;  %v356_v41 = vsub.f32 %v336_v42, %v348_v2  ;;  %v250_v42 = vand.u32 2147483647, %v244_v6 }
 0x186   :  { %v475_v16 = vadd.f32 %v469_v21, %v379_v7  ;;  %v362_v27 = vmul.f32 2.0, %v356_v41 }
 0x188   :  { %v502_v62 = vsel %vm1067_vm13, %v475_v16, 0.0 }
 0x189   :  { %v507_v12 = vadd.f32 %v506_v18, %v502_v62 }
 0x18b   :  { %v306_v3 = vpop.permute.xlu0 %305  ;;  %v318_v15 = vpop.permute.xlu1 %317 }
 0x18c   :  { %v402_v23 = vpop.permute.xlu2 %401  ;;  %v326_v45 = vsub.f32 %v306_v3, %v318_v15 }
 0x18e   :  { %v368_v29 = vadd.f32 %v362_v27, %v326_v45 }
 0x190   :  { %v374_v0 = vand.u32 2147483647, %v368_v29 }
 0x192   :  { %v380_v36 = vadd.f32 %v374_v0, %v1018_v32 }
 0x193   :  { %v350_v55 = vpop.permute.xlu0 %349  ;;  %v390_v37 = vpop.permute.xlu1 %389 }
 0x194   :  { %v410_v30 = vadd.f32 %v402_v23, %v390_v37  ;;  %v278_v31 = vpop.permute.xlu2 %277  ;;  %v357_v59 = vsub.f32 %v338_v28, %v350_v55 }
 0x195   :  { %v285_v40 = vadd.f32 %v278_v31, %v267_v61  ;;  %v460_v61 = vmul.f32 6.0, %v1016_v60 }
 0x196   :  { %v452_v22 = vadd.f32 %v446_v56, %v410_v30  ;;  %v363_v13 = vmul.f32 2.0, %v357_v59 }
 0x197   :  { %v291_v17 = vand.u32 2147483647, %v285_v40 }
 0x198   :  { %v464_v33 = vadd.f32 %v458_v34, %v452_v22 }
 0x199   :  { %v297_v47 = vadd.f32 %v291_v17, %v249_v24 }
 0x19a   :  { %v470_v46 = vand.u32 2147483647, %v464_v33 }
 0x19b   :  { %v422_v19 = vpop.permute.xlu0 %421  ;;  %v434_v1 = vpop.permute.xlu1 %433 }
 0x19c   :  { %v476_v54 = vadd.f32 %v470_v46, %v380_v36  ;;  %v340_v50 = vpop.permute.xlu2 %339  ;;  %v441_v14 = vadd.f32 %v434_v1, %v422_v19 }
 0x19e   :  { %v503_v52 = vsel %vm1048_vm9, %v476_v54, 0.0  ;;  %v447_v44 = vmul.f32 4.0, %v441_v14 }
 0x19f   :  { %v508_v26 = vadd.f32 %v507_v12, %v503_v52 }
 0x1a3   :  { %v308_v57 = vpop.permute.xlu0 %307  ;;  %v320_v58 = vpop.permute.xlu1 %319 }
 0x1a4   :  { %v404_v8 = vpop.permute.xlu2 %403  ;;  %v327_v38 = vsub.f32 %v308_v57, %v320_v58 }
 0x1a6   :  { %v369_v4 = vadd.f32 %v363_v13, %v327_v38 }
 0x1a8   :  { %v375_v11 = vand.u32 2147483647, %v369_v4 }
 0x1aa   :  { %v381_v7 = vadd.f32 %v375_v11, %v297_v47 }
 0x1ab   :  { %v352_v9 = vpop.permute.xlu0 %351  ;;  %v392_v32 = vpop.permute.xlu1 %391 }
 0x1ac   :  { %v411_v10 = vadd.f32 %v404_v8, %v392_v32  ;;  %v280_v18 = vpop.permute.xlu2 %279  ;;  %v358_v39 = vsub.f32 %v340_v50, %v352_v9 }
 0x1ad   :  { %v286_v20 = vadd.f32 %v280_v18, %v268_v35 }
 0x1ae   :  { %v453_v25 = vadd.f32 %v447_v44, %v411_v10  ;;  %v364_v45 = vmul.f32 2.0, %v358_v39 }
 0x1af   :  { %v292_v21 = vand.u32 2147483647, %v286_v20 }
 0x1b0   :  { %v465_v2 = vadd.f32 %v459_v49, %v453_v25 }
 0x1b1   :  { %v298_v16 = vadd.f32 %v292_v21, %v250_v42 }
 0x1b2   :  { %v471_v28 = vand.u32 2147483647, %v465_v2 }
 0x1b3   :  { %v424_v62 = vpop.permute.xlu0 %423  ;;  %v436_v12 = vpop.permute.xlu1 %435 }
 0x1b4   :  { %v477_v48 = vadd.f32 %v471_v28, %v381_v7  ;;  %v442_v27 = vadd.f32 %v436_v12, %v424_v62  ;;  %v394_v5 = vpop.permute.xlu2 %393 }
 0x1b6   :  { %v504_v51 = vsel %vm1055_vm10, %v477_v48, 0.0  ;;  %v448_v29 = vmul.f32 4.0, %v442_v27 }
 0x1b7   :  { %v509_v3 = vadd.f32 %v508_v26, %v504_v51 }
 0x1bb   :  { %v310_v15 = vpop.permute.xlu0 %309  ;;  %v322_v41 = vpop.permute.xlu1 %321 }
 0x1bc   :  { %v328_v23 = vsub.f32 %v310_v15, %v322_v41 }
 0x1be   :  { %v370_v43 = vadd.f32 %v364_v45, %v328_v23 }
 0x1c0   :  { %v376_v37 = vand.u32 2147483647, %v370_v43 }
 0x1c2   :  { %v382_v31 = vadd.f32 %v376_v37, %v298_v16 }
 0x1c3   :  { %v406_v6 = vpop.permute.xlu0 %405 }
 0x1c4   :  { %v412_v55 = vadd.f32 %v406_v6, %v394_v5 }
 0x1c6   :  { %v454_v56 = vadd.f32 %v448_v29, %v412_v55 }
 0x1c8   :  { %v466_v30 = vadd.f32 %v460_v61, %v454_v56 }
 0x1ca   :  { %v472_v53 = vand.u32 2147483647, %v466_v30 }
 0x1cc   :  { %v478_v0 = vadd.f32 %v472_v53, %v382_v31 }
 0x1ce   :  { %v505_v34 = vsel %vm1067_vm13, %v478_v0, 0.0 }
 0x1cf   :  { %v510_v22 = vadd.f32 %v509_v3, %v505_v34 }
 0x1d1   :  { %511 = vadd.xlane.f32.xlu1 %v510_v22 }
 0x244   :  { %v512_v40 = vpop.xlane.xlu1 %511 }
 0x245   :  { %v513_v24 = vrot.slane %v512_v40, 4 }
 0x247   :  { %v514_v33 = vadd.f32 %v513_v24, %v512_v40 }
 0x249   :  { %v515_v17 = vrot.slane %v514_v33, 2 }
 0x24b   :  { %v516_v36 = vadd.f32 %v515_v17, %v514_v33 }
 0x24d   :  { %v517_v46 = vrot.slane %v516_v36, 1 }
 0x24f   :  { %v518_v47 = vadd.f32 %v517_v46, %v516_v36 }
 0x251   :  { %541 = vpush %v518_v47 }
 0x282   :  { %s542_s28 = spop %541 }
 0x283   :  { %v520_v60 = vstv %s542_s28 }
 0x284   :  { %522 = vst.msk [vmem:[#allocation8] sm:$0x1] %vm521_vm14, %v520_v60 }
 0x285   :  { %533 = dma.vmem_to_hbm [thread:$0]  %s529_s27, 16, %s531_s25, [#allocation5]  }
 0x286   :  { %629 = dma.done.wait [#allocation5], 16  }
 0x287   :  { %630 = vsyncadd [#allocation5], 4294967280 }
 0x288   :  { %538 = vsyncpa [#allocation4], 1 }
 0x289   :  { %539 = vsyncpa [#allocation7], 1 }
 0x28a   :  { %540 = vsyncpa [#allocation5], 1 }

</bundles_post_ra>
